<compile_context>
chip_gen: v7x
topology: tpu7x:2x2x1
jax: 0.10.0
libtpu: 0.0.40
codegen_flags: <defaults>
</compile_context>

<pallas_src>
import functools

import jax
import jax.numpy as jnp
from jax.experimental import pallas as pl
from jax.experimental.pallas import tpu as pltpu


def _round_up(x, m):
    return (x + m - 1) // m * m


def _policy_head_kernel(x_ref, w1_ref, b1_ref, w3_ref, b3_ref, out_ref):
    """One batch tile: out = relu(x @ w1 + b1) @ w3 + b3 (fc2 intentionally absent)."""
    x = x_ref[...]

    # fc1 (MXU, f32 accumulation) + bias/relu in f32 on the VPU.
    h1 = jnp.dot(x, w1_ref[...], preferred_element_type=jnp.float32) + b1_ref[...]
    h1 = jnp.maximum(h1, 0.0)

    # fc3 applied to layer1 (NOT layer2), exactly as in the torch forward.
    out_ref[...] = (
        jnp.dot(h1.astype(w3_ref.dtype), w3_ref[...],
                preferred_element_type=jnp.float32)
        + b3_ref[...]
    ).astype(out_ref.dtype)


@functools.partial(jax.jit, static_argnames=("compute_dtype", "max_tile_b"))
def policy_gradient_forward(state, params, *, compute_dtype=jnp.bfloat16,
                            max_tile_b=512):
    """state: (B, n_input_features) f32. params: (w1, b1, w2, b2, w3, b3) with weights
    stored (in_features, out_features). Returns action logits (B, n_actions) f32.

    w2/b2 are accepted (to mirror the torch module) but never enter the kernel,
    since the returned `action` does not depend on fc2."""
    w1, b1, _w2, _b2, w3, b3 = params

    B, d_in = state.shape
    h = w1.shape[1]
    a = w3.shape[1]

    # Lane-dense padded sizes.
    d_in_p = _round_up(d_in, 128)
    h_p = _round_up(h, 128)
    a_p = _round_up(a, 128)

    # Batch tile: multiple of 8 (sublane), capped so double-buffered activations plus
    # resident weights stay well under the 32 MiB scoped-VMEM default (v7x-safe).
    tile_b = min(max_tile_b, _round_up(B, 8))
    b_p = _round_up(B, tile_b)

    act_itemsize = jnp.dtype(compute_dtype).itemsize
    vmem_est = (
        2 * tile_b * (d_in_p * act_itemsize + a_p * 4)      # double-buffered in/out tiles
        + (d_in_p * h_p + h_p * a_p) * act_itemsize          # resident weights
        + (h_p + a_p) * 4                                    # resident biases (f32)
        + tile_b * h_p * 4                                   # h1 intermediate
    )
    assert vmem_est < 32 * 1024 * 1024, "tile too large for v7x scoped VMEM budget"

    # Zero-pad everything (zeros in padded rows/cols cannot perturb the valid outputs:
    # padded w1 cols pair with zero b1 entries -> h1 pad cols are 0 after relu, and
    # padded w3 rows are 0).
    cd = compute_dtype
    x_p = jnp.zeros((b_p, d_in_p), cd).at[:B, :d_in].set(state.astype(cd))
    w1_p = jnp.zeros((d_in_p, h_p), cd).at[:d_in, :h].set(w1.astype(cd))
    b1_p = jnp.zeros((1, h_p), jnp.float32).at[:, :h].set(
        b1.reshape(1, h).astype(jnp.float32))
    w3_p = jnp.zeros((h_p, a_p), cd).at[:h, :a].set(w3.astype(cd))
    b3_p = jnp.zeros((1, a_p), jnp.float32).at[:, :a].set(
        b3.reshape(1, a).astype(jnp.float32))

    grid = (b_p // tile_b,)

    out_padded = pl.pallas_call(
        _policy_head_kernel,
        out_shape=jax.ShapeDtypeStruct((b_p, a_p), jnp.float32),
        grid=grid,
        in_specs=[
            pl.BlockSpec((tile_b, d_in_p), lambda i: (i, 0)),   # state: tiled over batch
            pl.BlockSpec((d_in_p, h_p), lambda i: (0, 0)),      # w1: VMEM-resident
            pl.BlockSpec((1, h_p), lambda i: (0, 0)),           # b1: VMEM-resident
            pl.BlockSpec((h_p, a_p), lambda i: (0, 0)),         # w3: VMEM-resident
            pl.BlockSpec((1, a_p), lambda i: (0, 0)),           # b3: VMEM-resident
        ],
        out_specs=pl.BlockSpec((tile_b, a_p), lambda i: (i, 0)),
        compiler_params=pltpu.CompilerParams(
            dimension_semantics=("parallel",),       # megacore split on v7x
            vmem_limit_bytes=32 * 1024 * 1024,
        ),
    )(x_p, w1_p, b1_p, w3_p, b3_p)

    # Slice away the batch / lane padding.
    return out_padded[:B, :a]


def init_params(key, n_input_features, n_fc1, n_actions):
    """Deterministic init matching torch.nn.Linear default U(-1/sqrt(fan_in), +1/sqrt(fan_in)).
    Weights stored as (in, out) for row-major x @ W matmuls."""
    ks = jax.random.split(key, 6)

    def linear(kw, kb, fan_in, fan_out):
        bound = 1.0 / jnp.sqrt(jnp.float32(fan_in))
        w = jax.random.uniform(kw, (fan_in, fan_out), jnp.float32, -bound, bound)
        b = jax.random.uniform(kb, (fan_out,), jnp.float32, -bound, bound)
        return w, b

    w1, b1 = linear(ks[0], ks[1], n_input_features, n_fc1)
    w2, b2 = linear(ks[2], ks[3], n_fc1, n_fc1)        # present in the module, unused by forward output
    w3, b3 = linear(ks[4], ks[5], n_fc1, n_actions)
    return (w1, b1, w2, b2, w3, b3)


def _ref_forward(state, params, compute_dtype):
    """Pure-JAX reference with identical dtype handling (bf16 operands, f32 accumulation)."""
    w1, b1, _w2, _b2, w3, b3 = params
    cd = compute_dtype
    h1 = jnp.dot(state.astype(cd), w1.astype(cd),
                 preferred_element_type=jnp.float32) + b1.astype(jnp.float32)
    h1 = jnp.maximum(h1, 0.0)
    return (jnp.dot(h1.astype(cd), w3.astype(cd),
                    preferred_element_type=jnp.float32) + b3.astype(jnp.float32))


if __name__ == "__main__":
    # Small shapes consistent with the module's forward.
    batch = 8
    n_input_features = 16
    n_fc1 = 32
    n_actions = 4

    key = jax.random.PRNGKey(0)
    k_state, k_params = jax.random.split(key)

    state = jax.random.normal(k_state, (batch, n_input_features), jnp.float32)
    params = init_params(k_params, n_input_features, n_fc1, n_actions)

    action = policy_gradient_forward(state, params)
    action = jax.block_until_ready(action)

    ref = _ref_forward(state, params, jnp.bfloat16)
    assert action.shape == (batch, n_actions)
    assert jnp.allclose(action, ref, atol=1e-2, rtol=1e-2), (
        f"max abs err {jnp.max(jnp.abs(action - ref))}")

    # TODO(synk): torch.autograd.set_detect_anomaly / optim.Adam are training-side and
    # have no forward-pass Pallas equivalent; only the returned `action` is implemented.
    print("KERNEL_OK")
</pallas_src>

<mosaic_0001>
module attributes {stable_mosaic.version = 11 : i64} {
  func.func @_policy_head_kernel(%arg0: i32, %arg1: memref<8x128xbf16, #tpu.memory_space<vmem>>, %arg2: memref<128x128xbf16, #tpu.memory_space<vmem>>, %arg3: memref<1x128xf32, #tpu.memory_space<vmem>>, %arg4: memref<128x128xbf16, #tpu.memory_space<vmem>>, %arg5: memref<1x128xf32, #tpu.memory_space<vmem>>, %arg6: memref<8x128xf32, #tpu.memory_space<vmem>>) attributes {dimension_semantics = [#tpu.dimension_semantics<parallel>], iteration_bounds = array<i64: 1>, scalar_prefetch = 0 : i64, scratch_operands = 0 : i64, tpu.core_type = #tpu.core_type<tc>, window_params = [{transform_indices = @transform_0, window_bounds = array<i64: 8, 128>}, {pipeline_mode = #tpu.pipeline_mode<synchronous>, transform_indices = @transform_1, window_bounds = array<i64: 128, 128>}, {pipeline_mode = #tpu.pipeline_mode<synchronous>, transform_indices = @transform_2, window_bounds = array<i64: 1, 128>}, {pipeline_mode = #tpu.pipeline_mode<synchronous>, transform_indices = @transform_3, window_bounds = array<i64: 128, 128>}, {pipeline_mode = #tpu.pipeline_mode<synchronous>, transform_indices = @transform_4, window_bounds = array<i64: 1, 128>}, {transform_indices = @transform_5, window_bounds = array<i64: 8, 128>}]} {
    %c0 = arith.constant 0 : index
    %c0_0 = arith.constant 0 : index
    %0 = vector.load %arg1[%c0, %c0_0] : memref<8x128xbf16, #tpu.memory_space<vmem>>, vector<8x128xbf16>
    %c0_1 = arith.constant 0 : index
    %c0_2 = arith.constant 0 : index
    %1 = vector.load %arg2[%c0_1, %c0_2] : memref<128x128xbf16, #tpu.memory_space<vmem>>, vector<128x128xbf16>
    %cst = arith.constant dense<0.000000e+00> : vector<8x128xf32>
    %2 = tpu.matmul %0, %1, %cst {dimension_numbers = #tpu.dot_dimension_numbers<[1], [0], [0], [1], [0, 0, 1, 1], [], []>} : vector<8x128xbf16>, vector<128x128xbf16>, vector<8x128xf32> -> vector<8x128xf32>
    %c0_3 = arith.constant 0 : index
    %c0_4 = arith.constant 0 : index
    %3 = vector.load %arg3[%c0_3, %c0_4] : memref<1x128xf32, #tpu.memory_space<vmem>>, vector<1x128xf32>
    %4 = vector.broadcast %3 : vector<1x128xf32> to vector<8x128xf32>
    %5 = arith.addf %2, %4 : vector<8x128xf32>
    %cst_5 = arith.constant 0.000000e+00 : f32
    %6 = vector.broadcast %cst_5 : f32 to vector<8x128xf32>
    %7 = arith.maximumf %5, %6 : vector<8x128xf32>
    %8 = arith.truncf %7 : vector<8x128xf32> to vector<8x128xbf16>
    %c0_6 = arith.constant 0 : index
    %c0_7 = arith.constant 0 : index
    %9 = vector.load %arg4[%c0_6, %c0_7] : memref<128x128xbf16, #tpu.memory_space<vmem>>, vector<128x128xbf16>
    %cst_8 = arith.constant dense<0.000000e+00> : vector<8x128xf32>
    %10 = tpu.matmul %8, %9, %cst_8 {dimension_numbers = #tpu.dot_dimension_numbers<[1], [0], [0], [1], [0, 0, 1, 1], [], []>} : vector<8x128xbf16>, vector<128x128xbf16>, vector<8x128xf32> -> vector<8x128xf32>
    %c0_9 = arith.constant 0 : index
    %c0_10 = arith.constant 0 : index
    %11 = vector.load %arg5[%c0_9, %c0_10] : memref<1x128xf32, #tpu.memory_space<vmem>>, vector<1x128xf32>
    %12 = vector.broadcast %11 : vector<1x128xf32> to vector<8x128xf32>
    %13 = arith.addf %10, %12 : vector<8x128xf32>
    %c0_11 = arith.constant 0 : index
    %c0_12 = arith.constant 0 : index
    %14 = vector.load %arg6[%c0_11, %c0_12] : memref<8x128xf32, #tpu.memory_space<vmem>>, vector<8x128xf32>
    tpu.vector_store %arg6[%c0_11, %c0_12], %13 {strides = array<i32>} : memref<8x128xf32, #tpu.memory_space<vmem>>, vector<8x128xf32>,
    return
  }
  func.func @transform_0(%arg0: i32) -> (i32, i32) {
    %c0_i32 = arith.constant 0 : i32
    %c0_i32_0 = arith.constant 0 : i32
    return %arg0, %c0_i32 : i32, i32
  }
  func.func @transform_1(%arg0: i32) -> (i32, i32) {
    %c0_i32 = arith.constant 0 : i32
    %c0_i32_0 = arith.constant 0 : i32
    %c0_i32_1 = arith.constant 0 : i32
    return %c0_i32, %c0_i32_0 : i32, i32
  }
  func.func @transform_2(%arg0: i32) -> (i32, i32) {
    %c0_i32 = arith.constant 0 : i32
    %c0_i32_0 = arith.constant 0 : i32
    %c0_i32_1 = arith.constant 0 : i32
    return %c0_i32, %c0_i32_0 : i32, i32
  }
  func.func @transform_3(%arg0: i32) -> (i32, i32) {
    %c0_i32 = arith.constant 0 : i32
    %c0_i32_0 = arith.constant 0 : i32
    %c0_i32_1 = arith.constant 0 : i32
    return %c0_i32, %c0_i32_0 : i32, i32
  }
  func.func @transform_4(%arg0: i32) -> (i32, i32) {
    %c0_i32 = arith.constant 0 : i32
    %c0_i32_0 = arith.constant 0 : i32
    %c0_i32_1 = arith.constant 0 : i32
    return %c0_i32, %c0_i32_0 : i32, i32
  }
  func.func @transform_5(%arg0: i32) -> (i32, i32) {
    %c0_i32 = arith.constant 0 : i32
    %c0_i32_0 = arith.constant 0 : i32
    return %arg0, %c0_i32 : i32, i32
  }
}

</mosaic_0001>

<bundles_post_ra>
// kernel: policy_gradient_forward.1
= control target key start
LH: loop header
LB: loop body
LE: loop exit
PB: predicated region body
PF: predicated region fallthrough
CT: control target
= control target key end

     0   :  { %v345_v0 = vmov 0.0   ;;  %vm346_vm0 = vmmov 0   ;;  %s437_s1 = inlined_call_operand.vmem [shape: bf16[128,128], index: 1, kind: input, shape index: {}]   ;;  %s438_s3 = inlined_call_operand.vmem [shape: bf16[128,128], index: 3, kind: input, shape index: {}]   ;;  %s439_s0 = inlined_call_operand.vmem [shape: bf16[8,128], index: 0, kind: input, shape index: {}]   ;;  %s440_s2 = inlined_call_operand.vmem [shape: f32[1,128], index: 2, kind: input, shape index: {}]   ;;  %s441_s4 = inlined_call_operand.vmem [shape: f32[1,128], index: 4, kind: input, shape index: {}]   ;;  %s442_s5 = inlined_call_operand.vmem [shape: f32[8,128], index: 5, kind: output, shape index: {}]  }
   0x1   :  { %287 = vmatprep.subr.bf16.mxu0 %v345_v0  ;;  %v329_v1 = vld [vmem:[%s437_s1] sm:$0xff]   ;;  %303 = vmatprep.mubr.msk.bf16.mxu0 %vm346_vm0, %v345_v0  ;;  %v330_v2 = vld [vmem:[%s437_s1 + $0x8] sm:$0xff]   ;;  %v331_v3 = vld [vmem:[%s437_s1 + $0x10] sm:$0xff]  }
   0x2   :  { %307 = vmatprep.subr.bf16.mxu1 %v345_v0  ;;  %323 = vmatprep.mubr.msk.bf16.mxu1 %vm346_vm0, %v345_v0  ;;  %v337_v4 = vld [vmem:[%s438_s3] sm:$0xff]   ;;  %v332_v5 = vld [vmem:[%s437_s1 + $0x18] sm:$0xff]   ;;  %v338_v6 = vld [vmem:[%s438_s3 + $0x8] sm:$0xff]  }
   0x3   :  { %288 = vmatpush3.bf16.msra.mxu0 %v329_v1  ;;  %308 = vmatpush3.bf16.msra.mxu1 %v337_v4  ;;  %v333_v7 = vld [vmem:[%s437_s1 + $0x20] sm:$0xff]   ;;  %v339_v8 = vld [vmem:[%s438_s3 + $0x10] sm:$0xff]   ;;  %v334_v9 = vld [vmem:[%s437_s1 + $0x28] sm:$0xff]  }
   0x4   :  { %289 = vmatprep.subr.bf16.mxu0 %v345_v0  ;;  %309 = vmatprep.subr.bf16.mxu1 %v345_v0  ;;  %v340_v10 = vld [vmem:[%s438_s3 + $0x18] sm:$0xff]   ;;  %v335_v11 = vld [vmem:[%s437_s1 + $0x30] sm:$0xff]   ;;  %v341_v12 = vld [vmem:[%s438_s3 + $0x20] sm:$0xff]  }
   0x5   :  { %v336_v13 = vld [vmem:[%s437_s1 + $0x38] sm:$0xff]   ;;  %v342_v14 = vld [vmem:[%s438_s3 + $0x28] sm:$0xff]   ;;  %v21_v15 = vld [vmem:[%s439_s0] sm:$0xf] }
   0x6   :  { %v343_v16 = vld [vmem:[%s438_s3 + $0x30] sm:$0xff]   ;;  %v344_v17 = vld [vmem:[%s438_s3 + $0x38] sm:$0xff]   ;;  %v251_v18 = vld [vmem:[%s440_s2] ss:$0 sm:$0xff] }
   0x7   :  { %290 = vmatpush3.bf16.msra.mxu0 %v330_v2  ;;  %310 = vmatpush3.bf16.msra.mxu1 %v338_v6  ;;  %v260_v26 = vld [vmem:[%s441_s4] ss:$0 sm:$0xff] }
   0x8   :  { %291 = vmatprep.subr.bf16.mxu0 %v345_v0  ;;  %311 = vmatprep.subr.bf16.mxu1 %v345_v0 }
   0xb   :  { %292 = vmatpush3.bf16.msra.mxu0 %v331_v3  ;;  %312 = vmatpush3.bf16.msra.mxu1 %v339_v8 }
   0xc   :  { %293 = vmatprep.subr.bf16.mxu0 %v345_v0  ;;  %313 = vmatprep.subr.bf16.mxu1 %v345_v0 }
   0xf   :  { %294 = vmatpush3.bf16.msra.mxu0 %v332_v5  ;;  %314 = vmatpush3.bf16.msra.mxu1 %v340_v10 }
  0x10   :  { %295 = vmatprep.subr.bf16.mxu0 %v345_v0  ;;  %315 = vmatprep.subr.bf16.mxu1 %v345_v0 }
  0x13   :  { %296 = vmatpush3.bf16.msra.mxu0 %v333_v7  ;;  %316 = vmatpush3.bf16.msra.mxu1 %v341_v12 }
  0x14   :  { %297 = vmatprep.subr.bf16.mxu0 %v345_v0  ;;  %317 = vmatprep.subr.bf16.mxu1 %v345_v0 }
  0x17   :  { %298 = vmatpush3.bf16.msra.mxu0 %v334_v9  ;;  %318 = vmatpush3.bf16.msra.mxu1 %v342_v14 }
  0x18   :  { %299 = vmatprep.subr.bf16.mxu0 %v345_v0  ;;  %319 = vmatprep.subr.bf16.mxu1 %v345_v0 }
  0x1b   :  { %300 = vmatpush3.bf16.msra.mxu0 %v335_v11  ;;  %320 = vmatpush3.bf16.msra.mxu1 %v343_v16 }
  0x1c   :  { %301 = vmatprep.subr.bf16.mxu0 %v345_v0  ;;  %321 = vmatprep.subr.bf16.mxu1 %v345_v0 }
  0x1f   :  { %302 = vmatpush3.bf16.msra.mxu0 %v336_v13  ;;  %322 = vmatpush3.bf16.msra.mxu1 %v344_v17 }
  0x22   :  { %304 = vmatmul.mubr.bf16.vlgmr.msra.gmra.mrb[0].mxu0 %v21_v15 }
  0xf5   :  { %v127_v19 = vpop.f32.mrb[0].mxu0 }
  0xf6   :  { %v128_v20 = vadd.f32 %v251_v18, %v127_v19  ;;  %v305_v21 = vpop.f32.mrb[1].mxu0 }
  0xf7   :  { %v130_v22 = vpop.f32.mrb[2].mxu0 }
  0xf8   :  { %v133_v23 = vmax.f32 %v128_v20, 0.0  ;;  %v306_v24 = vpop.f32.mrb[3].mxu0 }
  0xfa   :  { %v134_v25 = vpack.c.bf16 %v133_v23, %v133_v23 }
  0xfc   :  { %324 = vmatmul.mubr.bf16.vlgmr.msra.gmra.mrb[0].mxu1 %v134_v25 }
 0x1cf   :  { %v240_v27 = vpop.f32.mrb[0].mxu1 }
 0x1d0   :  { %v241_v28 = vadd.f32 %v260_v26, %v240_v27  ;;  %v325_v29 = vpop.f32.mrb[1].mxu1 }
 0x1d1   :  { %v243_v30 = vpop.f32.mrb[2].mxu1 }
 0x1d2   :  { %246 = vst [vmem:[%s442_s5] sm:$0xff] %v241_v28  ;;  %v326_v31 = vpop.f32.mrb[3].mxu1 }

</bundles_post_ra>
